<compile_context>
chip_gen: v5e
topology: v5e:2x2
jax: 0.10.0
libtpu: 0.0.40
codegen_flags: <defaults>
</compile_context>

<pallas_src>
import jax
import jax.numpy as jnp
from jax.experimental import pallas as pl
from jax.experimental.pallas import tpu as pltpu

_BN_EPS = 1e-5
_NEG_LARGE = -1e30   # bias for padded class columns -> exp() underflows to 0
_LANE = 128
_SUBLANE = 16        # batch-tile alignment (safe for bf16 sublane packing)


def _round_up(x, m):
    return ((x + m - 1) // m) * m


def _cdiv(a, b):
    return (a + b - 1) // b


# ----------------------------------------------------------------------------
# Kernel
# ----------------------------------------------------------------------------
def cls_head_kernel(x_ref,
                    w1_ref, c1_ref,
                    w2_ref, c2_ref,
                    w3_ref, c3_ref,
                    w4_ref, b4_ref,
                    out_ref):
    """One batch tile of: 3x (Linear + folded-BN + ReLU) -> Linear -> softmax."""
    h = x_ref[...]  # native dtype (f32 or bf16); no forced upcast

    # Hidden layers: y = relu(x @ (W*a) + c)   (Dropout = identity in eval)
    for w_ref, c_ref in ((w1_ref, c1_ref), (w2_ref, c2_ref), (w3_ref, c3_ref)):
        y = jnp.dot(h.astype(w_ref.dtype), w_ref[...],
                    preferred_element_type=jnp.float32)
        h = jnp.maximum(y + c_ref[...], 0.0)          # f32 epilogue (v5e-safe)

    # Final layer into a lane-dense (padded-to-128) logits slab.
    logits = jnp.dot(h.astype(w4_ref.dtype), w4_ref[...],
                     preferred_element_type=jnp.float32) + b4_ref[...]

    # Numerically stable softmax over the padded class axis. Padded columns
    # carry a -1e30 bias so their exp() is exactly 0.  Exact division keeps
    # each row summing to 1 (approx reciprocal previously broke this).
    m = jnp.max(logits, axis=-1, keepdims=True)
    e = jnp.exp(logits - m)
    denom = jnp.sum(e, axis=-1, keepdims=True)
    probs = e / denom

    out_ref[...] = probs.astype(out_ref.dtype)


# ----------------------------------------------------------------------------
# Wrapper
# ----------------------------------------------------------------------------
def _vmem_budget_bytes():
    """Generation-aware usable VMEM budget (with compiler-scratch headroom)."""
    try:
        cap = int(pltpu.get_tpu_info().vmem_capacity_bytes)
    except Exception:
        cap = 128 * 1024 * 1024
    if cap <= 64 * 1024 * 1024:          # v7x-class: 64 MiB physical per TC
        return 48 * 1024 * 1024
    return 100 * 1024 * 1024             # v5e / v6e: 128 MiB physical


def cls_head_forward(feats, kparams, *, out_dtype=None, tb_cap=4096,
                     feats_buffers=2):
    """feats: [B, D]; kparams: output of fold_params(). Returns [B, num_classes]."""
    B, D = feats.shape
    num_classes = kparams["num_classes"]
    c_pad = kparams["b4"].shape[1]
    out_dtype = feats.dtype if out_dtype is None else out_dtype

    weight_args = (kparams["W1"], kparams["c1"],
                   kparams["W2"], kparams["c2"],
                   kparams["W3"], kparams["c3"],
                   kparams["W4"], kparams["b4"])

    # ---- budget-driven batch tile ------------------------------------------
    budget = _vmem_budget_bytes()
    x_bytes = jnp.dtype(feats.dtype).itemsize
    o_bytes = jnp.dtype(out_dtype).itemsize
    w_bytes = sum(int(a.size) * jnp.dtype(a.dtype).itemsize for a in weight_args)
    hidden = [kparams["W1"].shape[1], kparams["W2"].shape[1], kparams["W3"].shape[1]]
    # Conservative per-row streamed/scratch bytes: pipelined feats tile,
    # double-buffered output tile, f32 intermediates of every layer.
    per_row = (max(feats_buffers, 2) * D * x_bytes
               + 2 * c_pad * o_bytes
               + 4 * (D + sum(hidden) + c_pad))
    headroom = 2 * 1024 * 1024
    avail = budget - 2 * w_bytes - headroom          # weights counted x2 (worst case)
    tb_budget = max(_SUBLANE,
                    min((avail // per_row) // _SUBLANE * _SUBLANE, tb_cap))

    # >= 2 grid steps whenever possible (dual-TC v7x / megacore), and split B
    # evenly over the minimal number of tiles so padded-tail work stays small.
    min_tiles = 2 if B > _SUBLANE else 1
    n_tiles = max(_cdiv(B, tb_budget), min_tiles)
    tb = _round_up(_cdiv(B, n_tiles), _SUBLANE)
    b_pad = _round_up(B, tb)

    if b_pad != B:
        feats = jnp.pad(feats, ((0, b_pad - B), (0, 0)))

    def build(use_pipeline_mode):
        def resident(arr):
            # Grid-invariant -> single-buffer when supported (saves ~w_bytes VMEM).
            if use_pipeline_mode:
                return pl.BlockSpec(arr.shape, lambda i: (0,) * arr.ndim,
                                    pipeline_mode=pl.Buffered(1))
            return pl.BlockSpec(arr.shape, lambda i: (0,) * arr.ndim)

        if use_pipeline_mode and feats_buffers != 2:
            x_spec = pl.BlockSpec((tb, D), lambda i: (i, 0),
                                  pipeline_mode=pl.Buffered(feats_buffers))
        else:
            x_spec = pl.BlockSpec((tb, D), lambda i: (i, 0))

        in_specs = [x_spec] + [resident(a) for a in weight_args]
        out_spec = pl.BlockSpec((tb, c_pad), lambda i: (i, 0))

        return pl.pallas_call(
            cls_head_kernel,
            out_shape=jax.ShapeDtypeStruct((b_pad, c_pad), out_dtype),
            grid=(b_pad // tb,),
            in_specs=in_specs,
            out_specs=out_spec,
            compiler_params=pltpu.CompilerParams(
                dimension_semantics=("parallel",),   # shard batch grid across TCs
                vmem_limit_bytes=int(budget)),
        )

    use_pm = hasattr(pl, "Buffered")
    try:
        out = build(use_pm)(feats, *weight_args)
    except Exception:
        if not use_pm:
            raise
        # Fallback: default double-buffered specs (correctness identical).
        out = build(False)(feats, *weight_args)

    return out[:B, :num_classes]


# ----------------------------------------------------------------------------
# Parameters (PyTorch-equivalent raw params + host-side folding)
# ----------------------------------------------------------------------------
def make_torch_params(key, head_in_dim, num_classes, dtype=jnp.float32):
    """Synthetic parameters with the same shapes/roles as the PyTorch module."""
    dims = [head_in_dim, head_in_dim // 2, head_in_dim // 4,
            head_in_dim // 8, num_classes]
    raw = {"dims": dims}
    keys = jax.random.split(key, 20)
    ki = 0
    for layer in range(4):
        fan_in, fan_out = dims[layer], dims[layer + 1]
        bound = 1.0 / float(fan_in) ** 0.5
        raw[f"W{layer+1}"] = jax.random.uniform(
            keys[ki], (fan_in, fan_out), dtype, minval=-bound, maxval=bound); ki += 1
        raw[f"b{layer+1}"] = jax.random.uniform(
            keys[ki], (fan_out,), dtype, minval=-bound, maxval=bound); ki += 1
        if layer < 3:   # BatchNorm1d affine + running stats (eval mode)
            raw[f"bn{layer+1}_gamma"] = 1.0 + 0.1 * jax.random.uniform(
                keys[ki], (fan_out,), dtype); ki += 1
            raw[f"bn{layer+1}_beta"] = 0.1 * jax.random.normal(
                keys[ki], (fan_out,), dtype); ki += 1
            raw[f"bn{layer+1}_mean"] = 0.1 * jax.random.normal(
                keys[ki], (fan_out,), dtype); ki += 1
            raw[f"bn{layer+1}_var"] = 1.0 + 0.1 * jax.random.uniform(
                keys[ki], (fan_out,), dtype); ki += 1
    return raw


def fold_params(raw, *, weight_dtype=jnp.bfloat16):
    """Fold BN scale into weight columns; lane-pad hidden widths and class axis.

    bf16 weights are the production default (halves streamed/resident bytes,
    f32 MXU accumulation in-kernel); pass weight_dtype=jnp.float32 for the
    bit-tight validation path.
    """
    dims = raw["dims"]
    num_classes = int(dims[-1])
    kp = {"num_classes": num_classes}

    hidden_pad = [max(_LANE, _round_up(int(dims[i + 1]), _LANE)) for i in range(3)]
    c_pad = max(_LANE, _round_up(num_classes, _LANE))
    in_dims = [int(dims[0])] + hidden_pad            # padded input width per layer

    for layer in range(3):
        w = raw[f"W{layer+1}"].astype(jnp.float32)
        b = raw[f"b{layer+1}"].astype(jnp.float32)
        gamma = raw[f"bn{layer+1}_gamma"].astype(jnp.float32)
        beta = raw[f"bn{layer+1}_beta"].astype(jnp.float32)
        mean = raw[f"bn{layer+1}_mean"].astype(jnp.float32)
        var = raw[f"bn{layer+1}_var"].astype(jnp.float32)
        a = gamma / jnp.sqrt(var + _BN_EPS)           # per-channel BN scale
        w_f = w * a[None, :]
        c_f = a * (b - mean) + beta
        rows, cols = in_dims[layer], hidden_pad[layer]
        w_p = jnp.zeros((rows, cols), jnp.float32)
        w_p = w_p.at[:w.shape[0], :w.shape[1]].set(w_f)
        c_p = jnp.zeros((1, cols), jnp.float32).at[:, :w.shape[1]].set(c_f)
        kp[f"W{layer+1}"] = w_p.astype(weight_dtype)
        kp[f"c{layer+1}"] = c_p                       # keep f32 epilogue shift

    # Final Linear: pad hidden rows and class columns to lane-dense sizes.
    w4 = raw["W4"].astype(jnp.float32)
    b4 = raw["b4"].astype(jnp.float32)
    w4p = jnp.zeros((hidden_pad[2], c_pad), jnp.float32)
    w4p = w4p.at[:w4.shape[0], :num_classes].set(w4)
    b4p = jnp.full((1, c_pad), _NEG_LARGE, jnp.float32).at[:, :num_classes].set(b4)
    kp["W4"] = w4p.astype(weight_dtype)
    kp["b4"] = b4p                                    # keep f32 (pad sentinel)
    return kp


def cls_head_reference(feats, raw):
    """Pure-JAX reference reproducing the PyTorch eval forward from raw params."""
    h = feats.astype(jnp.float32)
    for layer in range(3):
        y = h @ raw[f"W{layer+1}"] + raw[f"b{layer+1}"]
        y = ((y - raw[f"bn{layer+1}_mean"]) /
             jnp.sqrt(raw[f"bn{layer+1}_var"] + _BN_EPS)
             * raw[f"bn{layer+1}_gamma"] + raw[f"bn{layer+1}_beta"])
        h = jnp.maximum(y, 0.0)
    logits = h @ raw["W4"] + raw["b4"]
    return jax.nn.softmax(logits, axis=-1)


# ----------------------------------------------------------------------------
# Demo / correctness check
# ----------------------------------------------------------------------------
if __name__ == "__main__":
    B = 8
    head_in_dim = 64
    num_classes = 10

    key = jax.random.PRNGKey(0)
    k_feat, k_param = jax.random.split(key)
    feats = jax.random.normal(k_feat, (B, head_in_dim), jnp.float32)
    raw = make_torch_params(k_param, head_in_dim, num_classes)
    ref = cls_head_reference(feats, raw)

    # f32 validation path (tight tolerance).
    kp_f32 = fold_params(raw, weight_dtype=jnp.float32)
    probs = jax.block_until_ready(
        cls_head_forward(feats, kp_f32, out_dtype=jnp.float32))
    assert probs.shape == (B, num_classes)
    assert jnp.allclose(jnp.sum(probs, axis=-1), 1.0, atol=1e-3)
    assert jnp.allclose(probs, ref, atol=1e-3, rtol=1e-3)

    # bf16 production path: bf16 feats/weights streamed, bf16 output slab.
    kp_bf16 = fold_params(raw)                         # default bf16 weights
    probs_bf = jax.block_until_ready(
        cls_head_forward(feats.astype(jnp.bfloat16), kp_bf16))
    probs_bf32 = probs_bf.astype(jnp.float32)
    assert probs_bf.shape == (B, num_classes)
    assert jnp.allclose(jnp.sum(probs_bf32, axis=-1), 1.0, atol=3e-2)
    assert jnp.allclose(probs_bf32, ref, atol=5e-2, rtol=5e-2)

    print("KERNEL_OK")
</pallas_src>

<mosaic_0001>
module attributes {stable_mosaic.version = 11 : i64} {
  func.func @cls_head_kernel(%arg0: i32, %arg1: memref<16x64xf32, #tpu.memory_space<vmem>>, %arg2: memref<64x128xf32, #tpu.memory_space<vmem>>, %arg3: memref<1x128xf32, #tpu.memory_space<vmem>>, %arg4: memref<128x128xf32, #tpu.memory_space<vmem>>, %arg5: memref<1x128xf32, #tpu.memory_space<vmem>>, %arg6: memref<128x128xf32, #tpu.memory_space<vmem>>, %arg7: memref<1x128xf32, #tpu.memory_space<vmem>>, %arg8: memref<128x128xf32, #tpu.memory_space<vmem>>, %arg9: memref<1x128xf32, #tpu.memory_space<vmem>>, %arg10: memref<16x128xf32, #tpu.memory_space<vmem>>) attributes {dimension_semantics = [#tpu.dimension_semantics<parallel>], iteration_bounds = array<i64: 1>, scalar_prefetch = 0 : i64, scratch_operands = 0 : i64, tpu.core_type = #tpu.core_type<tc>, window_params = [{transform_indices = @transform_0, window_bounds = array<i64: 16, 64>}, {pipeline_mode = #tpu.pipeline_mode<synchronous>, transform_indices = @transform_1, window_bounds = array<i64: 64, 128>}, {pipeline_mode = #tpu.pipeline_mode<synchronous>, transform_indices = @transform_2, window_bounds = array<i64: 1, 128>}, {pipeline_mode = #tpu.pipeline_mode<synchronous>, transform_indices = @transform_3, window_bounds = array<i64: 128, 128>}, {pipeline_mode = #tpu.pipeline_mode<synchronous>, transform_indices = @transform_4, window_bounds = array<i64: 1, 128>}, {pipeline_mode = #tpu.pipeline_mode<synchronous>, transform_indices = @transform_5, window_bounds = array<i64: 128, 128>}, {pipeline_mode = #tpu.pipeline_mode<synchronous>, transform_indices = @transform_6, window_bounds = array<i64: 1, 128>}, {pipeline_mode = #tpu.pipeline_mode<synchronous>, transform_indices = @transform_7, window_bounds = array<i64: 128, 128>}, {pipeline_mode = #tpu.pipeline_mode<synchronous>, transform_indices = @transform_8, window_bounds = array<i64: 1, 128>}, {transform_indices = @transform_9, window_bounds = array<i64: 16, 128>}]} {
    %c0 = arith.constant 0 : index
    %c0_0 = arith.constant 0 : index
    %0 = vector.load %arg1[%c0, %c0_0] : memref<16x64xf32, #tpu.memory_space<vmem>>, vector<16x64xf32>
    %c0_1 = arith.constant 0 : index
    %c0_2 = arith.constant 0 : index
    %1 = vector.load %arg2[%c0_1, %c0_2] : memref<64x128xf32, #tpu.memory_space<vmem>>, vector<64x128xf32>
    %cst = arith.constant dense<0.000000e+00> : vector<16x128xf32>
    %2 = tpu.matmul %0, %1, %cst {dimension_numbers = #tpu.dot_dimension_numbers<[1], [0], [0], [1], [0, 0, 1, 1], [], []>} : vector<16x64xf32>, vector<64x128xf32>, vector<16x128xf32> -> vector<16x128xf32>
    %c0_3 = arith.constant 0 : index
    %c0_4 = arith.constant 0 : index
    %3 = vector.load %arg3[%c0_3, %c0_4] : memref<1x128xf32, #tpu.memory_space<vmem>>, vector<1x128xf32>
    %4 = vector.broadcast %3 : vector<1x128xf32> to vector<16x128xf32>
    %5 = arith.addf %2, %4 : vector<16x128xf32>
    %cst_5 = arith.constant 0.000000e+00 : f32
    %6 = vector.broadcast %cst_5 : f32 to vector<16x128xf32>
    %7 = arith.maximumf %5, %6 : vector<16x128xf32>
    %c0_6 = arith.constant 0 : index
    %c0_7 = arith.constant 0 : index
    %8 = vector.load %arg4[%c0_6, %c0_7] : memref<128x128xf32, #tpu.memory_space<vmem>>, vector<128x128xf32>
    %cst_8 = arith.constant dense<0.000000e+00> : vector<16x128xf32>
    %9 = tpu.matmul %7, %8, %cst_8 {dimension_numbers = #tpu.dot_dimension_numbers<[1], [0], [0], [1], [0, 0, 1, 1], [], []>} : vector<16x128xf32>, vector<128x128xf32>, vector<16x128xf32> -> vector<16x128xf32>
    %c0_9 = arith.constant 0 : index
    %c0_10 = arith.constant 0 : index
    %10 = vector.load %arg5[%c0_9, %c0_10] : memref<1x128xf32, #tpu.memory_space<vmem>>, vector<1x128xf32>
    %11 = vector.broadcast %10 : vector<1x128xf32> to vector<16x128xf32>
    %12 = arith.addf %9, %11 : vector<16x128xf32>
    %cst_11 = arith.constant 0.000000e+00 : f32
    %13 = vector.broadcast %cst_11 : f32 to vector<16x128xf32>
    %14 = arith.maximumf %12, %13 : vector<16x128xf32>
    %c0_12 = arith.constant 0 : index
    %c0_13 = arith.constant 0 : index
    %15 = vector.load %arg6[%c0_12, %c0_13] : memref<128x128xf32, #tpu.memory_space<vmem>>, vector<128x128xf32>
    %cst_14 = arith.constant dense<0.000000e+00> : vector<16x128xf32>
    %16 = tpu.matmul %14, %15, %cst_14 {dimension_numbers = #tpu.dot_dimension_numbers<[1], [0], [0], [1], [0, 0, 1, 1], [], []>} : vector<16x128xf32>, vector<128x128xf32>, vector<16x128xf32> -> vector<16x128xf32>
    %c0_15 = arith.constant 0 : index
    %c0_16 = arith.constant 0 : index
    %17 = vector.load %arg7[%c0_15, %c0_16] : memref<1x128xf32, #tpu.memory_space<vmem>>, vector<1x128xf32>
    %18 = vector.broadcast %17 : vector<1x128xf32> to vector<16x128xf32>
    %19 = arith.addf %16, %18 : vector<16x128xf32>
    %cst_17 = arith.constant 0.000000e+00 : f32
    %20 = vector.broadcast %cst_17 : f32 to vector<16x128xf32>
    %21 = arith.maximumf %19, %20 : vector<16x128xf32>
    %c0_18 = arith.constant 0 : index
    %c0_19 = arith.constant 0 : index
    %22 = vector.load %arg8[%c0_18, %c0_19] : memref<128x128xf32, #tpu.memory_space<vmem>>, vector<128x128xf32>
    %cst_20 = arith.constant dense<0.000000e+00> : vector<16x128xf32>
    %23 = tpu.matmul %21, %22, %cst_20 {dimension_numbers = #tpu.dot_dimension_numbers<[1], [0], [0], [1], [0, 0, 1, 1], [], []>} : vector<16x128xf32>, vector<128x128xf32>, vector<16x128xf32> -> vector<16x128xf32>
    %c0_21 = arith.constant 0 : index
    %c0_22 = arith.constant 0 : index
    %24 = vector.load %arg9[%c0_21, %c0_22] : memref<1x128xf32, #tpu.memory_space<vmem>>, vector<1x128xf32>
    %25 = vector.broadcast %24 : vector<1x128xf32> to vector<16x128xf32>
    %26 = arith.addf %23, %25 : vector<16x128xf32>
    %cst_23 = arith.constant dense<0xFF800000> : vector<16xf32>
    %27 = vector.multi_reduction <maximumf>, %26, %cst_23 [1] : vector<16x128xf32> to vector<16xf32>
    %28 = vector.shape_cast %27 : vector<16xf32> to vector<16x1xf32>
    %29 = vector.broadcast %28 : vector<16x1xf32> to vector<16x128xf32>
    %30 = arith.subf %26, %29 : vector<16x128xf32>
    %31 = math.exp %30 : vector<16x128xf32>
    %cst_24 = arith.constant dense<0.000000e+00> : vector<16xf32>
    %32 = vector.multi_reduction <add>, %31, %cst_24 [1] : vector<16x128xf32> to vector<16xf32>
    %33 = vector.shape_cast %32 : vector<16xf32> to vector<16x1xf32>
    %34 = vector.broadcast %33 : vector<16x1xf32> to vector<16x128xf32>
    %35 = arith.divf %31, %34 : vector<16x128xf32>
    %c0_25 = arith.constant 0 : index
    %c0_26 = arith.constant 0 : index
    %36 = vector.load %arg10[%c0_25, %c0_26] : memref<16x128xf32, #tpu.memory_space<vmem>>, vector<16x128xf32>
    tpu.vector_store %arg10[%c0_25, %c0_26], %35 {strides = array<i32>} : memref<16x128xf32, #tpu.memory_space<vmem>>, vector<16x128xf32>,
    return
  }
  func.func @transform_0(%arg0: i32) -> (i32, i32) {
    %c0_i32 = arith.constant 0 : i32
    %c0_i32_0 = arith.constant 0 : i32
    return %arg0, %c0_i32 : i32, i32
  }
  func.func @transform_1(%arg0: i32) -> (i32, i32) {
    %c0_i32 = arith.constant 0 : i32
    %c0_i32_0 = arith.constant 0 : i32
    %c0_i32_1 = arith.constant 0 : i32
    return %c0_i32, %c0_i32_0 : i32, i32
  }
  func.func @transform_2(%arg0: i32) -> (i32, i32) {
    %c0_i32 = arith.constant 0 : i32
    %c0_i32_0 = arith.constant 0 : i32
    %c0_i32_1 = arith.constant 0 : i32
    return %c0_i32, %c0_i32_0 : i32, i32
  }
  func.func @transform_3(%arg0: i32) -> (i32, i32) {
    %c0_i32 = arith.constant 0 : i32
    %c0_i32_0 = arith.constant 0 : i32
    %c0_i32_1 = arith.constant 0 : i32
    return %c0_i32, %c0_i32_0 : i32, i32
  }
  func.func @transform_4(%arg0: i32) -> (i32, i32) {
    %c0_i32 = arith.constant 0 : i32
    %c0_i32_0 = arith.constant 0 : i32
    %c0_i32_1 = arith.constant 0 : i32
    return %c0_i32, %c0_i32_0 : i32, i32
  }
  func.func @transform_5(%arg0: i32) -> (i32, i32) {
    %c0_i32 = arith.constant 0 : i32
    %c0_i32_0 = arith.constant 0 : i32
    %c0_i32_1 = arith.constant 0 : i32
    return %c0_i32, %c0_i32_0 : i32, i32
  }
  func.func @transform_6(%arg0: i32) -> (i32, i32) {
    %c0_i32 = arith.constant 0 : i32
    %c0_i32_0 = arith.constant 0 : i32
    %c0_i32_1 = arith.constant 0 : i32
    return %c0_i32, %c0_i32_0 : i32, i32
  }
  func.func @transform_7(%arg0: i32) -> (i32, i32) {
    %c0_i32 = arith.constant 0 : i32
    %c0_i32_0 = arith.constant 0 : i32
    %c0_i32_1 = arith.constant 0 : i32
    return %c0_i32, %c0_i32_0 : i32, i32
  }
  func.func @transform_8(%arg0: i32) -> (i32, i32) {
    %c0_i32 = arith.constant 0 : i32
    %c0_i32_0 = arith.constant 0 : i32
    %c0_i32_1 = arith.constant 0 : i32
    return %c0_i32, %c0_i32_0 : i32, i32
  }
  func.func @transform_9(%arg0: i32) -> (i32, i32) {
    %c0_i32 = arith.constant 0 : i32
    %c0_i32_0 = arith.constant 0 : i32
    return %arg0, %c0_i32 : i32, i32
  }
}

module attributes {stable_mosaic.version = 11 : i64} {
  func.func @cls_head_kernel(%arg0: i32, %arg1: memref<16x64xf32, #tpu.memory_space<vmem>>, %arg2: memref<64x128xf32, #tpu.memory_space<vmem>>, %arg3: memref<1x128xf32, #tpu.memory_space<vmem>>, %arg4: memref<128x128xf32, #tpu.memory_space<vmem>>, %arg5: memref<1x128xf32, #tpu.memory_space<vmem>>, %arg6: memref<128x128xf32, #tpu.memory_space<vmem>>, %arg7: memref<1x128xf32, #tpu.memory_space<vmem>>, %arg8: memref<128x128xf32, #tpu.memory_space<vmem>>, %arg9: memref<1x128xf32, #tpu.memory_space<vmem>>, %arg10: memref<16x128xf32, #tpu.memory_space<vmem>>) attributes {dimension_semantics = [#tpu.dimension_semantics<parallel>], iteration_bounds = array<i64: 1>, scalar_prefetch = 0 : i64, scratch_operands = 0 : i64, tpu.core_type = #tpu.core_type<tc>, window_params = [{transform_indices = @transform_0, window_bounds = array<i64: 16, 64>}, {pipeline_mode = #tpu.pipeline_mode<synchronous>, transform_indices = @transform_1, window_bounds = array<i64: 64, 128>}, {pipeline_mode = #tpu.pipeline_mode<synchronous>, transform_indices = @transform_2, window_bounds = array<i64: 1, 128>}, {pipeline_mode = #tpu.pipeline_mode<synchronous>, transform_indices = @transform_3, window_bounds = array<i64: 128, 128>}, {pipeline_mode = #tpu.pipeline_mode<synchronous>, transform_indices = @transform_4, window_bounds = array<i64: 1, 128>}, {pipeline_mode = #tpu.pipeline_mode<synchronous>, transform_indices = @transform_5, window_bounds = array<i64: 128, 128>}, {pipeline_mode = #tpu.pipeline_mode<synchronous>, transform_indices = @transform_6, window_bounds = array<i64: 1, 128>}, {pipeline_mode = #tpu.pipeline_mode<synchronous>, transform_indices = @transform_7, window_bounds = array<i64: 128, 128>}, {pipeline_mode = #tpu.pipeline_mode<synchronous>, transform_indices = @transform_8, window_bounds = array<i64: 1, 128>}, {transform_indices = @transform_9, window_bounds = array<i64: 16, 128>}]} {
    %c0 = arith.constant 0 : index
    %c0_0 = arith.constant 0 : index
    %0 = vector.load %arg1[%c0, %c0_0] : memref<16x64xf32, #tpu.memory_space<vmem>>, vector<16x64xf32>
    %c0_1 = arith.constant 0 : index
    %c0_2 = arith.constant 0 : index
    %1 = vector.load %arg2[%c0_1, %c0_2] : memref<64x128xf32, #tpu.memory_space<vmem>>, vector<64x128xf32>
    %cst = arith.constant dense<0.000000e+00> : vector<16x128xf32>
    %2 = tpu.matmul %0, %1, %cst {dimension_numbers = #tpu.dot_dimension_numbers<[1], [0], [0], [1], [0, 0, 1, 1], [], []>} : vector<16x64xf32>, vector<64x128xf32>, vector<16x128xf32> -> vector<16x128xf32>
    %c0_3 = arith.constant 0 : index
    %c0_4 = arith.constant 0 : index
    %3 = vector.load %arg3[%c0_3, %c0_4] : memref<1x128xf32, #tpu.memory_space<vmem>>, vector<1x128xf32>
    %4 = vector.broadcast %3 : vector<1x128xf32> to vector<16x128xf32>
    %5 = arith.addf %2, %4 : vector<16x128xf32>
    %cst_5 = arith.constant 0.000000e+00 : f32
    %6 = vector.broadcast %cst_5 : f32 to vector<16x128xf32>
    %7 = arith.maximumf %5, %6 : vector<16x128xf32>
    %c0_6 = arith.constant 0 : index
    %c0_7 = arith.constant 0 : index
    %8 = vector.load %arg4[%c0_6, %c0_7] : memref<128x128xf32, #tpu.memory_space<vmem>>, vector<128x128xf32>
    %cst_8 = arith.constant dense<0.000000e+00> : vector<16x128xf32>
    %9 = tpu.matmul %7, %8, %cst_8 {dimension_numbers = #tpu.dot_dimension_numbers<[1], [0], [0], [1], [0, 0, 1, 1], [], []>} : vector<16x128xf32>, vector<128x128xf32>, vector<16x128xf32> -> vector<16x128xf32>
    %c0_9 = arith.constant 0 : index
    %c0_10 = arith.constant 0 : index
    %10 = vector.load %arg5[%c0_9, %c0_10] : memref<1x128xf32, #tpu.memory_space<vmem>>, vector<1x128xf32>
    %11 = vector.broadcast %10 : vector<1x128xf32> to vector<16x128xf32>
    %12 = arith.addf %9, %11 : vector<16x128xf32>
    %cst_11 = arith.constant 0.000000e+00 : f32
    %13 = vector.broadcast %cst_11 : f32 to vector<16x128xf32>
    %14 = arith.maximumf %12, %13 : vector<16x128xf32>
    %c0_12 = arith.constant 0 : index
    %c0_13 = arith.constant 0 : index
    %15 = vector.load %arg6[%c0_12, %c0_13] : memref<128x128xf32, #tpu.memory_space<vmem>>, vector<128x128xf32>
    %cst_14 = arith.constant dense<0.000000e+00> : vector<16x128xf32>
    %16 = tpu.matmul %14, %15, %cst_14 {dimension_numbers = #tpu.dot_dimension_numbers<[1], [0], [0], [1], [0, 0, 1, 1], [], []>} : vector<16x128xf32>, vector<128x128xf32>, vector<16x128xf32> -> vector<16x128xf32>
    %c0_15 = arith.constant 0 : index
    %c0_16 = arith.constant 0 : index
    %17 = vector.load %arg7[%c0_15, %c0_16] : memref<1x128xf32, #tpu.memory_space<vmem>>, vector<1x128xf32>
    %18 = vector.broadcast %17 : vector<1x128xf32> to vector<16x128xf32>
    %19 = arith.addf %16, %18 : vector<16x128xf32>
    %cst_17 = arith.constant 0.000000e+00 : f32
    %20 = vector.broadcast %cst_17 : f32 to vector<16x128xf32>
    %21 = arith.maximumf %19, %20 : vector<16x128xf32>
    %c0_18 = arith.constant 0 : index
    %c0_19 = arith.constant 0 : index
    %22 = vector.load %arg8[%c0_18, %c0_19] : memref<128x128xf32, #tpu.memory_space<vmem>>, vector<128x128xf32>
    %cst_20 = arith.constant dense<0.000000e+00> : vector<16x128xf32>
    %23 = tpu.matmul %21, %22, %cst_20 {dimension_numbers = #tpu.dot_dimension_numbers<[1], [0], [0], [1], [0, 0, 1, 1], [], []>} : vector<16x128xf32>, vector<128x128xf32>, vector<16x128xf32> -> vector<16x128xf32>
    %c0_21 = arith.constant 0 : index
    %c0_22 = arith.constant 0 : index
    %24 = vector.load %arg9[%c0_21, %c0_22] : memref<1x128xf32, #tpu.memory_space<vmem>>, vector<1x128xf32>
    %25 = vector.broadcast %24 : vector<1x128xf32> to vector<16x128xf32>
    %26 = arith.addf %23, %25 : vector<16x128xf32>
    %cst_23 = arith.constant dense<0xFF800000> : vector<16xf32>
    %27 = vector.multi_reduction <maximumf>, %26, %cst_23 [1] : vector<16x128xf32> to vector<16xf32>
    %28 = vector.shape_cast %27 : vector<16xf32> to vector<16x1xf32>
    %29 = vector.broadcast %28 : vector<16x1xf32> to vector<16x128xf32>
    %30 = arith.subf %26, %29 : vector<16x128xf32>
    %31 = math.exp %30 : vector<16x128xf32>
    %cst_24 = arith.constant dense<0.000000e+00> : vector<16xf32>
    %32 = vector.multi_reduction <add>, %31, %cst_24 [1] : vector<16x128xf32> to vector<16xf32>
    %33 = vector.shape_cast %32 : vector<16xf32> to vector<16x1xf32>
    %34 = vector.broadcast %33 : vector<16x1xf32> to vector<16x128xf32>
    %35 = arith.divf %31, %34 : vector<16x128xf32>
    %c0_25 = arith.constant 0 : index
    %c0_26 = arith.constant 0 : index
    %36 = vector.load %arg10[%c0_25, %c0_26] : memref<16x128xf32, #tpu.memory_space<vmem>>, vector<16x128xf32>
    tpu.vector_store %arg10[%c0_25, %c0_26], %35 {strides = array<i32>} : memref<16x128xf32, #tpu.memory_space<vmem>>, vector<16x128xf32>,
    return
  }
  func.func @transform_0(%arg0: i32) -> (i32, i32) {
    %c0_i32 = arith.constant 0 : i32
    %c0_i32_0 = arith.constant 0 : i32
    return %arg0, %c0_i32 : i32, i32
  }
  func.func @transform_1(%arg0: i32) -> (i32, i32) {
    %c0_i32 = arith.constant 0 : i32
    %c0_i32_0 = arith.constant 0 : i32
    %c0_i32_1 = arith.constant 0 : i32
    return %c0_i32, %c0_i32_0 : i32, i32
  }
  func.func @transform_2(%arg0: i32) -> (i32, i32) {
    %c0_i32 = arith.constant 0 : i32
    %c0_i32_0 = arith.constant 0 : i32
    %c0_i32_1 = arith.constant 0 : i32
    return %c0_i32, %c0_i32_0 : i32, i32
  }
  func.func @transform_3(%arg0: i32) -> (i32, i32) {
    %c0_i32 = arith.constant 0 : i32
    %c0_i32_0 = arith.constant 0 : i32
    %c0_i32_1 = arith.constant 0 : i32
    return %c0_i32, %c0_i32_0 : i32, i32
  }
  func.func @transform_4(%arg0: i32) -> (i32, i32) {
    %c0_i32 = arith.constant 0 : i32
    %c0_i32_0 = arith.constant 0 : i32
    %c0_i32_1 = arith.constant 0 : i32
    return %c0_i32, %c0_i32_0 : i32, i32
  }
  func.func @transform_5(%arg0: i32) -> (i32, i32) {
    %c0_i32 = arith.constant 0 : i32
    %c0_i32_0 = arith.constant 0 : i32
    %c0_i32_1 = arith.constant 0 : i32
    return %c0_i32, %c0_i32_0 : i32, i32
  }
  func.func @transform_6(%arg0: i32) -> (i32, i32) {
    %c0_i32 = arith.constant 0 : i32
    %c0_i32_0 = arith.constant 0 : i32
    %c0_i32_1 = arith.constant 0 : i32
    return %c0_i32, %c0_i32_0 : i32, i32
  }
  func.func @transform_7(%arg0: i32) -> (i32, i32) {
    %c0_i32 = arith.constant 0 : i32
    %c0_i32_0 = arith.constant 0 : i32
    %c0_i32_1 = arith.constant 0 : i32
    return %c0_i32, %c0_i32_0 : i32, i32
  }
  func.func @transform_8(%arg0: i32) -> (i32, i32) {
    %c0_i32 = arith.constant 0 : i32
    %c0_i32_0 = arith.constant 0 : i32
    %c0_i32_1 = arith.constant 0 : i32
    return %c0_i32, %c0_i32_0 : i32, i32
  }
  func.func @transform_9(%arg0: i32) -> (i32, i32) {
    %c0_i32 = arith.constant 0 : i32
    %c0_i32_0 = arith.constant 0 : i32
    return %arg0, %c0_i32 : i32, i32
  }
}

</mosaic_0001>

<bundles_post_ra>
// kernel: tpu_custom_call.1
= control target key start
LH: loop header
LB: loop body
LE: loop exit
PB: predicated region body
PF: predicated region fallthrough
CT: control target
= control target key end

     0   :  { %14 = vsyncpa [#allocation3], 0  ;;  %s637_s0 = inlined_call_operand.hbm [shape: f32[16,64], index: 0, kind: input, shape index: {}]   ;;  %s638_s1 = inlined_call_operand.hbm [shape: f32[64,128], index: 1, kind: input, shape index: {}]   ;;  %s639_s2 = inlined_call_operand.vmem [shape: f32[1,128], index: 2, kind: input, shape index: {}]   ;;  %s640_s3 = inlined_call_operand.hbm [shape: f32[128,128], index: 3, kind: input, shape index: {}]   ;;  %s641_s4 = inlined_call_operand.vmem [shape: f32[1,128], index: 4, kind: input, shape index: {}]   ;;  %s642_s5 = inlined_call_operand.hbm [shape: f32[128,128], index: 5, kind: input, shape index: {}]   ;;  %s643_s6 = inlined_call_operand.vmem [shape: f32[1,128], index: 6, kind: input, shape index: {}]   ;;  %s644_s7 = inlined_call_operand.hbm [shape: f32[128,128], index: 7, kind: input, shape index: {}]   ;;  %s645_s8 = inlined_call_operand.vmem [shape: f32[1,128], index: 8, kind: input, shape index: {}]   ;;  %s646_s9 = inlined_call_operand.hbm [shape: f32[16,128], index: 9, kind: output, shape index: {}]  }
   0x1   :  { %15 = vsyncpa [#allocation6], 0 }
   0x2   :  { %16 = vsyncpa [#allocation9], 0 }
   0x3   :  { %17 = vsyncpa [#allocation4], 0  ;;  %s35_s11 = sshll.u32 %s638_s1, 4  ;;  %s531_s12 = smov [#allocation5]   ;;  %s36_s11 = int_to_ptr.hbm [resolvable:$true] %s35_s11 }
   0x4   :  { %s37_s13 = sshll.u32 %s531_s12, 4  ;;  %s65_s16 = sshll.u32 %s642_s5, 4  ;;  %s38_s13 = int_to_ptr.vmem [resolvable:$true] %s37_s13  ;;  %s66_s16 = int_to_ptr.hbm [resolvable:$true] %s65_s16 }
   0x5   :  { %s532_s17 = smov 128   ;;  %s533_s18 = smov 8  }
   0x6   :  { %43 = dma.hbm_to_vmem [thread:$0]  %s36_s11, 1024, %s38_s13, [#allocation6], %s532_s17, %s532_s17, %s533_s18  }
   0x7   :  { %s534_s19 = smov [#allocation8]   ;;  %s22_s1 = sshll.u32 %s637_s0, 4  ;;  %s23_s1 = int_to_ptr.hbm [resolvable:$true] %s22_s1 }
   0x8   :  { %s67_s20 = sshll.u32 %s534_s19, 4  ;;  %s50_s24 = sshll.u32 %s640_s3, 4  ;;  %s68_s20 = int_to_ptr.vmem [resolvable:$true] %s67_s20  ;;  %s51_s24 = int_to_ptr.hbm [resolvable:$true] %s50_s24 }
   0x9   :  { %73 = dma.hbm_to_vmem [thread:$0]  %s66_s16, 2048, %s68_s20, [#allocation9], %s532_s17, %s532_s17, %s533_s18  }
   0xa   :  { %s535_s25 = smov [#allocation2]   ;;  %s536_s27 = smov [#allocation7]  }
   0xb   :  { %s24_s26 = sshll.u32 %s535_s25, 4  ;;  %s52_s0 = sshll.u32 %s536_s27, 4  ;;  %s25_s26 = int_to_ptr.vmem [resolvable:$true] %s24_s26  ;;  %s53_s0 = int_to_ptr.vmem [resolvable:$true] %s52_s0 }
   0xc   :  { %30 = dma.hbm_to_vmem [thread:$0]  %s23_s1, 256, %s25_s26, [#allocation3], %s532_s17, %s532_s17, %s533_s18  }
   0xd   :  { %s80_s30 = sshll.u32 %s644_s7, 4  ;;  %s537_s3 = smov [#allocation10]   ;;  %s81_s30 = int_to_ptr.hbm [resolvable:$true] %s80_s30 }
   0xe   :  { %58 = dma.hbm_to_vmem [thread:$0]  %s51_s24, 2048, %s53_s0, [#allocation6], %s532_s17, %s532_s17, %s533_s18  }
   0xf   :  { %s82_s10 = sshll.u32 %s537_s3, 4  ;;  %s83_s10 = int_to_ptr.vmem [resolvable:$true] %s82_s10 }
  0x10   :  { %88 = dma.hbm_to_vmem [thread:$0]  %s81_s30, 2048, %s83_s10, [#allocation9], %s532_s17, %s532_s17, %s533_s18  }
  0x11   :  { %523 = dma.done.wait [#allocation3], 256  }
  0x12   :  { %524 = vsyncadd [#allocation3], 4294967040 }
  0x13   :  { %525 = dma.done.wait [#allocation6], 3072  }
  0x14   :  { %526 = vsyncadd [#allocation6], 4294964224 }
  0x15   :  { %527 = dma.done.wait [#allocation9], 4096  }
  0x16   :  { %528 = vsyncadd [#allocation9], 4294963200  ;;  %v120_v0 = vld [vmem:[#allocation5 + $0x38] sm:$0xff]  ;;  %v119_v1 = vld [vmem:[#allocation5 + $0x30] sm:$0xff]  ;;  %vm125_vm0 = vcmask 523264   ;;  %s342_s20 = sshll.u32 %s646_s9, 4  ;;  %s343_s20 = int_to_ptr.hbm [resolvable:$true] %s342_s20 }
  0x17   :  { %140 = vmatpush.msra.mxu0 %v120_v0  ;;  %v118_v2 = vld [vmem:[#allocation5 + $0x28] sm:$0xff]  ;;  %v172_v3 = vld [vmem:[#allocation7 + $0x78] sm:$0xff]  ;;  %v171_v4 = vld [vmem:[#allocation7 + $0x70] sm:$0xff] }
  0x18   :  { %v117_v5 = vld [vmem:[#allocation5 + $0x20] sm:$0xff]  ;;  %177 = vmatpush.msra.mxu1 %v172_v3  ;;  %v170_v6 = vld [vmem:[#allocation7 + $0x68] sm:$0xff]  ;;  %v116_v7 = vld [vmem:[#allocation5 + $0x18] sm:$0xff] }
  0x19   :  { %141 = vmatpush.msra.mxu0 %v119_v1  ;;  %v169_v8 = vld [vmem:[#allocation7 + $0x60] sm:$0xff]  ;;  %v115_v9 = vld [vmem:[#allocation5 + $0x10] sm:$0xff]  ;;  %v168_v10 = vld [vmem:[#allocation7 + $0x58] sm:$0xff] }
  0x1a   :  { %178 = vmatpush.msra.mxu1 %v171_v4  ;;  %v114_v11 = vld [vmem:[#allocation5 + $0x8] sm:$0xff]  ;;  %v167_v12 = vld [vmem:[#allocation7 + $0x50] sm:$0xff]  ;;  %v113_v13 = vld [vmem:[#allocation5] sm:$0xff] }
  0x1b   :  { %142 = vmatpush.msra.mxu0 %v118_v2  ;;  %v111_v14 = vld [vmem:[#allocation2] sm:$0xff]  ;;  %v166_v15 = vld [vmem:[#allocation7 + $0x48] sm:$0xff]  ;;  %v165_v16 = vld [vmem:[#allocation7 + $0x40] sm:$0xff] }
  0x1c   :  { %179 = vmatpush.msra.mxu1 %v170_v6  ;;  %v164_v17 = vld [vmem:[#allocation7 + $0x38] sm:$0xff]  ;;  %v163_v18 = vld [vmem:[#allocation7 + $0x30] sm:$0xff]  ;;  %v162_v20 = vld [vmem:[#allocation7 + $0x28] sm:$0xff] }
  0x1d   :  { %143 = vmatpush.msra.mxu0 %v117_v5  ;;  %v112_v19 = vld [vmem:[#allocation2 + $0x8] sm:$0xff]  ;;  %v161_v21 = vld [vmem:[#allocation7 + $0x20] sm:$0xff]  ;;  %v159_v23 = vld [vmem:[#allocation7 + $0x10] sm:$0xff] }
  0x1e   :  { %180 = vmatpush.msra.mxu1 %v169_v8  ;;  %v160_v22 = vld [vmem:[#allocation7 + $0x18] sm:$0xff]  ;;  %v158_v24 = vld [vmem:[#allocation7 + $0x8] sm:$0xff]  ;;  %v157_v25 = vld [vmem:[#allocation7] sm:$0xff] }
  0x1f   :  { %144 = vmatpush.msra.mxu0 %v116_v7  ;;  %v217_v26 = vld [vmem:[#allocation8 + $0x78] sm:$0xff]  ;;  %v216_v27 = vld [vmem:[#allocation8 + $0x70] sm:$0xff]  ;;  %v215_v28 = vld [vmem:[#allocation8 + $0x68] sm:$0xff] }
  0x20   :  { %181 = vmatpush.msra.mxu1 %v168_v10  ;;  %222 = vmatpush.msra.mxu2 %v217_v26  ;;  %v214_v29 = vld [vmem:[#allocation8 + $0x60] sm:$0xff]  ;;  %v213_v30 = vld [vmem:[#allocation8 + $0x58] sm:$0xff]  ;;  %v212_v31 = vld [vmem:[#allocation8 + $0x50] sm:$0xff] }
  0x21   :  { %145 = vmatpush.msra.mxu0 %v115_v9  ;;  %v211_v32 = vld [vmem:[#allocation8 + $0x48] sm:$0xff]  ;;  %v210_v33 = vld [vmem:[#allocation8 + $0x40] sm:$0xff]  ;;  %v209_v34 = vld [vmem:[#allocation8 + $0x38] sm:$0xff] }
  0x22   :  { %182 = vmatpush.msra.mxu1 %v167_v12  ;;  %223 = vmatpush.msra.mxu2 %v216_v27  ;;  %v367_v35 = vld [vmem:[%s639_s2] ss:$0 sm:$0xff]  ;;  %v207_v37 = vld [vmem:[#allocation8 + $0x28] sm:$0xff]  ;;  %v206_v40 = vld [vmem:[#allocation8 + $0x20] sm:$0xff] }
  0x23   :  { %146 = vmatpush.msra.mxu0 %v114_v11  ;;  %v208_v36 = vld [vmem:[#allocation8 + $0x30] sm:$0xff]  ;;  %v205_v42 = vld [vmem:[#allocation8 + $0x18] sm:$0xff]  ;;  %v203_v47 = vld [vmem:[#allocation8 + $0x8] sm:$0xff] }
  0x24   :  { %183 = vmatpush.msra.mxu1 %v166_v15  ;;  %224 = vmatpush.msra.mxu2 %v215_v28  ;;  %v204_v46 = vld [vmem:[#allocation8 + $0x10] sm:$0xff]  ;;  %v202_v48 = vld [vmem:[#allocation8] sm:$0xff]  ;;  %v262_v49 = vld [vmem:[#allocation10 + $0x78] sm:$0xff] }
  0x25   :  { %147 = vmatpush.msra.mxu0 %v113_v13  ;;  %v261_v50 = vld [vmem:[#allocation10 + $0x70] sm:$0xff]  ;;  %267 = vmatpush.msra.mxu3 %v262_v49  ;;  %v260_v51 = vld [vmem:[#allocation10 + $0x68] sm:$0xff]  ;;  %v259_v52 = vld [vmem:[#allocation10 + $0x60] sm:$0xff] }
  0x26   :  { %357 = vmatmul.msk.f32.vlgmr.msra.gmra.mxu0 %vm125_vm0, %v111_v14  ;;  %184 = vmatpush.msra.mxu1 %v165_v16  ;;  %v258_v53 = vld [vmem:[#allocation10 + $0x58] sm:$0xff]  ;;  %v257_v54 = vld [vmem:[#allocation10 + $0x50] sm:$0xff]  ;;  %v256_v55 = vld [vmem:[#allocation10 + $0x48] sm:$0xff] }
  0x27   :  { %225 = vmatpush.msra.mxu2 %v214_v29  ;;  %268 = vmatpush.msra.mxu3 %v261_v50  ;;  %v255_v56 = vld [vmem:[#allocation10 + $0x40] sm:$0xff]  ;;  %v254_v57 = vld [vmem:[#allocation10 + $0x38] sm:$0xff]  ;;  %v368_v58 = vld [vmem:[%s641_s4] ss:$0 sm:$0xff] }
  0x28   :  { %185 = vmatpush.msra.mxu1 %v164_v17  ;;  %v253_v59 = vld [vmem:[#allocation10 + $0x30] sm:$0xff]  ;;  %v252_v60 = vld [vmem:[#allocation10 + $0x28] sm:$0xff]  ;;  %v251_v63 = vld [vmem:[#allocation10 + $0x20] sm:$0xff] }
  0x29   :  { %226 = vmatpush.msra.mxu2 %v213_v30  ;;  %269 = vmatpush.msra.mxu3 %v260_v51  ;;  %v250_v1 = vld [vmem:[#allocation10 + $0x18] sm:$0xff]  ;;  %v249_v5 = vld [vmem:[#allocation10 + $0x10] sm:$0xff]  ;;  %v248_v6 = vld [vmem:[#allocation10 + $0x8] sm:$0xff] }
  0x2a   :  { %186 = vmatpush.msra.mxu1 %v163_v18  ;;  %v247_v7 = vld [vmem:[#allocation10] sm:$0xff]  ;;  %v369_v8 = vld [vmem:[%s643_s6] ss:$0 sm:$0xff]  ;;  %s538_s6 = smov [#allocation11]  }
  0x2b   :  { %227 = vmatpush.msra.mxu2 %v212_v31  ;;  %270 = vmatpush.msra.mxu3 %v259_v52  ;;  %v370_v15 = vld [vmem:[%s645_s8] ss:$0 sm:$0xff]  ;;  %s340_s8 = sshll.u32 %s538_s6, 4  ;;  %s341_s8 = int_to_ptr.vmem [resolvable:$true] %s340_s8 }
  0x2c   :  { %187 = vmatpush.msra.mxu1 %v162_v20 }
  0x2d   :  { %228 = vmatpush.msra.mxu2 %v211_v32  ;;  %271 = vmatpush.msra.mxu3 %v258_v53 }
  0x2e   :  { %358 = vmatmul.msk.f32.gmra.mxu0 %vm125_vm0, %v112_v19  ;;  %188 = vmatpush.msra.mxu1 %v161_v21 }
  0x2f   :  { %229 = vmatpush.msra.mxu2 %v210_v33  ;;  %272 = vmatpush.msra.mxu3 %v257_v54 }
  0x30   :  { %189 = vmatpush.msra.mxu1 %v160_v22 }
  0x31   :  { %230 = vmatpush.msra.mxu2 %v209_v34  ;;  %273 = vmatpush.msra.mxu3 %v256_v55 }
  0x32   :  { %190 = vmatpush.msra.mxu1 %v159_v23 }
  0x33   :  { %231 = vmatpush.msra.mxu2 %v208_v36  ;;  %274 = vmatpush.msra.mxu3 %v255_v56 }
  0x34   :  { %191 = vmatpush.msra.mxu1 %v158_v24 }
  0x35   :  { %232 = vmatpush.msra.mxu2 %v207_v37  ;;  %275 = vmatpush.msra.mxu3 %v254_v57 }
  0x36   :  { %192 = vmatpush.msra.mxu1 %v157_v25 }
  0x37   :  { %233 = vmatpush.msra.mxu2 %v206_v40  ;;  %276 = vmatpush.msra.mxu3 %v253_v59 }
  0x39   :  { %234 = vmatpush.msra.mxu2 %v205_v42  ;;  %277 = vmatpush.msra.mxu3 %v252_v60 }
  0x3b   :  { %235 = vmatpush.msra.mxu2 %v204_v46  ;;  %278 = vmatpush.msra.mxu3 %v251_v63 }
  0x3d   :  { %236 = vmatpush.msra.mxu2 %v203_v47  ;;  %279 = vmatpush.msra.mxu3 %v250_v1 }
  0x3f   :  { %237 = vmatpush.msra.mxu2 %v202_v48  ;;  %280 = vmatpush.msra.mxu3 %v249_v5 }
  0x41   :  { %281 = vmatpush.msra.mxu3 %v248_v6 }
  0x43   :  { %282 = vmatpush.msra.mxu3 %v247_v7 }
  0xa3   :  { %v149_v38 = vpop.f32.mrf.mxu0 }
  0xa4   :  { %v150_v39 = vadd.f32 %v367_v35, %v149_v38 }
  0xa6   :  { %v155_v41 = vmax.f32 %v150_v39, 0.0 }
  0xa8   :  { %193 = vmatmul.f32.vlgmr.msra.gmra.mxu1 %v155_v41 }
  0xab   :  { %v152_v43 = vpop.f32.mrf.mxu0 }
  0xac   :  { %v153_v44 = vadd.f32 %v367_v35, %v152_v43 }
  0xae   :  { %v156_v45 = vmax.f32 %v153_v44, 0.0 }
  0xb0   :  { %196 = vmatmul.f32.gmra.mxu1 %v156_v45 }
 0x125   :  { %v194_v61 = vpop.f32.mrf.mxu1 }
 0x126   :  { %v195_v62 = vadd.f32 %v368_v58, %v194_v61 }
 0x128   :  { %v200_v0 = vmax.f32 %v195_v62, 0.0 }
 0x12a   :  { %238 = vmatmul.f32.vlgmr.msra.gmra.mxu2 %v200_v0 }
 0x12d   :  { %v197_v2 = vpop.f32.mrf.mxu1 }
 0x12e   :  { %v198_v3 = vadd.f32 %v368_v58, %v197_v2 }
 0x130   :  { %v201_v4 = vmax.f32 %v198_v3, 0.0 }
 0x132   :  { %241 = vmatmul.f32.gmra.mxu2 %v201_v4 }
 0x1ad   :  { %v239_v9 = vpop.f32.mrf.mxu2 }
 0x1ae   :  { %v240_v10 = vadd.f32 %v369_v8, %v239_v9 }
 0x1b0   :  { %v245_v11 = vmax.f32 %v240_v10, 0.0 }
 0x1b2   :  { %283 = vmatmul.f32.vlgmr.msra.gmra.mxu3 %v245_v11 }
 0x1b5   :  { %v242_v12 = vpop.f32.mrf.mxu2 }
 0x1b6   :  { %v243_v13 = vadd.f32 %v369_v8, %v242_v12 }
 0x1b8   :  { %v246_v14 = vmax.f32 %v243_v13, 0.0 }
 0x1ba   :  { %286 = vmatmul.f32.gmra.mxu3 %v246_v14 }
 0x235   :  { %v284_v16 = vpop.f32.mrf.mxu3 }
 0x236   :  { %v285_v17 = vadd.f32 %v370_v15, %v284_v16 }
 0x238   :  { %290 = vmax.xlane.f32.xlu0 %v285_v17 }
 0x23d   :  { %v287_v18 = vpop.f32.mrf.mxu3 }
 0x23e   :  { %v288_v19 = vadd.f32 %v370_v15, %v287_v18 }
 0x240   :  { %292 = vmax.xlane.f32.xlu0 %v288_v19 }
 0x2ab   :  { %v291_v20 = vpop.xlane.xlu0 %290 }
 0x2ac   :  { %v294_v21 = vsub.f32 %v285_v17, %v291_v20 }
 0x2ae   :  { %v296_v22 = vmul.f32 1.442695, %v294_v21 }
 0x2b0   :  { %371 = vpow2.f32 %v296_v22 }
 0x2b3   :  { %v293_v23 = vpop.xlane.xlu0 %292 }
 0x2b4   :  { %v295_v24 = vsub.f32 %v288_v19, %v293_v23 }
 0x2b6   :  { %v372_v25 = vpop.eup %371  ;;  %v298_v26 = vmul.f32 1.442695, %v295_v24 }
 0x2b7   :  { %300 = vadd.xlane.f32.xlu1 %v372_v25 }
 0x2b8   :  { %373 = vpow2.f32 %v298_v26 }
 0x2be   :  { %v374_v27 = vpop.eup %373 }
 0x2bf   :  { %302 = vadd.xlane.f32.xlu1 %v374_v27 }
 0x32a   :  { %v301_v28 = vpop.xlane.xlu1 %300 }
 0x32b   :  { %375 = vrcp.f32 %v301_v28  ;;  %v315_v33 = vand.u32 2147483648, %v301_v28  ;;  %v313_v35 = vand.u32 2147483647, %v301_v28  ;;  %vm309_vm2 = vweird.f32 %v301_v28 }
 0x32d   :  { %v316_v38 = vor.u32 1.1754944e-38, %v315_v33  ;;  %vm314_vm4 = vcmp.eq.f32.partialorder %v313_v35, 8.507059e+37 }
 0x331   :  { %v376_v29 = vpop.eup %375 }
 0x332   :  { %v305_v30 = vmul.f32 %v376_v29, %v301_v28  ;;  %v303_v31 = vpop.xlane.xlu1 %302  ;;  %vm310_vm1 = vweird.f32 %v376_v29 }
 0x333   :  { %377 = vrcp.f32 %v303_v31  ;;  %vm311_vm3 = vmor %vm309_vm2, %vm310_vm1  ;;  %v330_v44 = vand.u32 2147483648, %v303_v31  ;;  %v328_v46 = vand.u32 2147483647, %v303_v31  ;;  %vm324_vm6 = vweird.f32 %v303_v31 }
 0x334   :  { %v306_v32 = vsub.f32 1.0, %v305_v30 }
 0x335   :  { %v331_v48 = vor.u32 1.1754944e-38, %v330_v44  ;;  %vm329_vm8 = vcmp.eq.f32.partialorder %v328_v46, 8.507059e+37 }
 0x336   :  { %v307_v34 = vmul.f32 %v376_v29, %v306_v32 }
 0x338   :  { %v308_v36 = vadd.f32 %v376_v29, %v307_v34 }
 0x339   :  { %v378_v37 = vpop.eup %377 }
 0x33a   :  { %v320_v39 = vmul.f32 %v378_v37, %v303_v31  ;;  %v312_v40 = vsel %vm311_vm3, %v376_v29, %v308_v36  ;;  %vm325_vm5 = vweird.f32 %v378_v37 }
 0x33b   :  { %v317_v41 = vsel %vm314_vm4, %v316_v38, %v312_v40  ;;  %vm326_vm7 = vmor %vm324_vm6, %vm325_vm5 }
 0x33c   :  { %v321_v42 = vsub.f32 1.0, %v320_v39  ;;  %v318_v43 = vmul.f32 %v372_v25, %v317_v41 }
 0x33e   :  { %v322_v45 = vmul.f32 %v378_v37, %v321_v42  ;;  %334 = vst [vmem:[#allocation11] sm:$0xff] %v318_v43 }
 0x340   :  { %v323_v47 = vadd.f32 %v378_v37, %v322_v45 }
 0x342   :  { %v327_v49 = vsel %vm326_vm7, %v378_v37, %v323_v47 }
 0x343   :  { %v332_v50 = vsel %vm329_vm8, %v331_v48, %v327_v49 }
 0x344   :  { %v333_v51 = vmul.f32 %v374_v27, %v332_v50 }
 0x346   :  { %335 = vst [vmem:[#allocation11 + $0x8] sm:$0xff] %v333_v51 }
 0x347   :  { %348 = dma.vmem_to_hbm [thread:$0]  %s341_s8, 256, %s343_s20, [#allocation4], %s532_s17, %s532_s17, %s533_s18  }
 0x348   :  { %529 = dma.done.wait [#allocation4], 256  }
 0x349   :  { %530 = vsyncadd [#allocation4], 4294967040 }
 0x34a   :  { %353 = vsyncpa [#allocation3], 1 }
 0x34b   :  { %354 = vsyncpa [#allocation6], 1 }
 0x34c   :  { %355 = vsyncpa [#allocation9], 1 }
 0x34d   :  { %356 = vsyncpa [#allocation4], 1 }

// kernel: tpu_custom_call.1
= control target key start
LH: loop header
LB: loop body
LE: loop exit
PB: predicated region body
PF: predicated region fallthrough
CT: control target
= control target key end

     0   :  { %14 = vsyncpa [#allocation3], 0  ;;  %s637_s0 = inlined_call_operand.hbm [shape: f32[16,64], index: 0, kind: input, shape index: {}]   ;;  %s638_s1 = inlined_call_operand.hbm [shape: f32[64,128], index: 1, kind: input, shape index: {}]   ;;  %s639_s2 = inlined_call_operand.vmem [shape: f32[1,128], index: 2, kind: input, shape index: {}]   ;;  %s640_s3 = inlined_call_operand.hbm [shape: f32[128,128], index: 3, kind: input, shape index: {}]   ;;  %s641_s4 = inlined_call_operand.vmem [shape: f32[1,128], index: 4, kind: input, shape index: {}]   ;;  %s642_s5 = inlined_call_operand.hbm [shape: f32[128,128], index: 5, kind: input, shape index: {}]   ;;  %s643_s6 = inlined_call_operand.vmem [shape: f32[1,128], index: 6, kind: input, shape index: {}]   ;;  %s644_s7 = inlined_call_operand.hbm [shape: f32[128,128], index: 7, kind: input, shape index: {}]   ;;  %s645_s8 = inlined_call_operand.vmem [shape: f32[1,128], index: 8, kind: input, shape index: {}]   ;;  %s646_s9 = inlined_call_operand.hbm [shape: f32[16,128], index: 9, kind: output, shape index: {}]  }
   0x1   :  { %15 = vsyncpa [#allocation6], 0 }
   0x2   :  { %16 = vsyncpa [#allocation9], 0 }
   0x3   :  { %17 = vsyncpa [#allocation4], 0  ;;  %s35_s11 = sshll.u32 %s638_s1, 4  ;;  %s531_s12 = smov [#allocation5]   ;;  %s36_s11 = int_to_ptr.hbm [resolvable:$true] %s35_s11 }
   0x4   :  { %s37_s13 = sshll.u32 %s531_s12, 4  ;;  %s65_s16 = sshll.u32 %s642_s5, 4  ;;  %s38_s13 = int_to_ptr.vmem [resolvable:$true] %s37_s13  ;;  %s66_s16 = int_to_ptr.hbm [resolvable:$true] %s65_s16 }
   0x5   :  { %s532_s17 = smov 128   ;;  %s533_s18 = smov 8  }
   0x6   :  { %43 = dma.hbm_to_vmem [thread:$0]  %s36_s11, 1024, %s38_s13, [#allocation6], %s532_s17, %s532_s17, %s533_s18  }
   0x7   :  { %s534_s19 = smov [#allocation8]   ;;  %s22_s1 = sshll.u32 %s637_s0, 4  ;;  %s23_s1 = int_to_ptr.hbm [resolvable:$true] %s22_s1 }
   0x8   :  { %s67_s20 = sshll.u32 %s534_s19, 4  ;;  %s50_s24 = sshll.u32 %s640_s3, 4  ;;  %s68_s20 = int_to_ptr.vmem [resolvable:$true] %s67_s20  ;;  %s51_s24 = int_to_ptr.hbm [resolvable:$true] %s50_s24 }
   0x9   :  { %73 = dma.hbm_to_vmem [thread:$0]  %s66_s16, 2048, %s68_s20, [#allocation9], %s532_s17, %s532_s17, %s533_s18  }
   0xa   :  { %s535_s25 = smov [#allocation2]   ;;  %s536_s27 = smov [#allocation7]  }
   0xb   :  { %s24_s26 = sshll.u32 %s535_s25, 4  ;;  %s52_s0 = sshll.u32 %s536_s27, 4  ;;  %s25_s26 = int_to_ptr.vmem [resolvable:$true] %s24_s26  ;;  %s53_s0 = int_to_ptr.vmem [resolvable:$true] %s52_s0 }
   0xc   :  { %30 = dma.hbm_to_vmem [thread:$0]  %s23_s1, 256, %s25_s26, [#allocation3], %s532_s17, %s532_s17, %s533_s18  }
   0xd   :  { %s80_s30 = sshll.u32 %s644_s7, 4  ;;  %s537_s3 = smov [#allocation10]   ;;  %s81_s30 = int_to_ptr.hbm [resolvable:$true] %s80_s30 }
   0xe   :  { %58 = dma.hbm_to_vmem [thread:$0]  %s51_s24, 2048, %s53_s0, [#allocation6], %s532_s17, %s532_s17, %s533_s18  }
   0xf   :  { %s82_s10 = sshll.u32 %s537_s3, 4  ;;  %s83_s10 = int_to_ptr.vmem [resolvable:$true] %s82_s10 }
  0x10   :  { %88 = dma.hbm_to_vmem [thread:$0]  %s81_s30, 2048, %s83_s10, [#allocation9], %s532_s17, %s532_s17, %s533_s18  }
  0x11   :  { %523 = dma.done.wait [#allocation3], 256  }
  0x12   :  { %524 = vsyncadd [#allocation3], 4294967040 }
  0x13   :  { %525 = dma.done.wait [#allocation6], 3072  }
  0x14   :  { %526 = vsyncadd [#allocation6], 4294964224 }
  0x15   :  { %527 = dma.done.wait [#allocation9], 4096  }
  0x16   :  { %528 = vsyncadd [#allocation9], 4294963200  ;;  %v120_v0 = vld [vmem:[#allocation5 + $0x38] sm:$0xff]  ;;  %v119_v1 = vld [vmem:[#allocation5 + $0x30] sm:$0xff]  ;;  %vm125_vm0 = vcmask 523264   ;;  %s342_s20 = sshll.u32 %s646_s9, 4  ;;  %s343_s20 = int_to_ptr.hbm [resolvable:$true] %s342_s20 }
  0x17   :  { %140 = vmatpush.msra.mxu0 %v120_v0  ;;  %v118_v2 = vld [vmem:[#allocation5 + $0x28] sm:$0xff]  ;;  %v172_v3 = vld [vmem:[#allocation7 + $0x78] sm:$0xff]  ;;  %v171_v4 = vld [vmem:[#allocation7 + $0x70] sm:$0xff] }
  0x18   :  { %v117_v5 = vld [vmem:[#allocation5 + $0x20] sm:$0xff]  ;;  %177 = vmatpush.msra.mxu1 %v172_v3  ;;  %v170_v6 = vld [vmem:[#allocation7 + $0x68] sm:$0xff]  ;;  %v116_v7 = vld [vmem:[#allocation5 + $0x18] sm:$0xff] }
  0x19   :  { %141 = vmatpush.msra.mxu0 %v119_v1  ;;  %v169_v8 = vld [vmem:[#allocation7 + $0x60] sm:$0xff]  ;;  %v115_v9 = vld [vmem:[#allocation5 + $0x10] sm:$0xff]  ;;  %v168_v10 = vld [vmem:[#allocation7 + $0x58] sm:$0xff] }
  0x1a   :  { %178 = vmatpush.msra.mxu1 %v171_v4  ;;  %v114_v11 = vld [vmem:[#allocation5 + $0x8] sm:$0xff]  ;;  %v167_v12 = vld [vmem:[#allocation7 + $0x50] sm:$0xff]  ;;  %v113_v13 = vld [vmem:[#allocation5] sm:$0xff] }
  0x1b   :  { %142 = vmatpush.msra.mxu0 %v118_v2  ;;  %v111_v14 = vld [vmem:[#allocation2] sm:$0xff]  ;;  %v166_v15 = vld [vmem:[#allocation7 + $0x48] sm:$0xff]  ;;  %v165_v16 = vld [vmem:[#allocation7 + $0x40] sm:$0xff] }
  0x1c   :  { %179 = vmatpush.msra.mxu1 %v170_v6  ;;  %v164_v17 = vld [vmem:[#allocation7 + $0x38] sm:$0xff]  ;;  %v163_v18 = vld [vmem:[#allocation7 + $0x30] sm:$0xff]  ;;  %v162_v20 = vld [vmem:[#allocation7 + $0x28] sm:$0xff] }
  0x1d   :  { %143 = vmatpush.msra.mxu0 %v117_v5  ;;  %v112_v19 = vld [vmem:[#allocation2 + $0x8] sm:$0xff]  ;;  %v161_v21 = vld [vmem:[#allocation7 + $0x20] sm:$0xff]  ;;  %v159_v23 = vld [vmem:[#allocation7 + $0x10] sm:$0xff] }
  0x1e   :  { %180 = vmatpush.msra.mxu1 %v169_v8  ;;  %v160_v22 = vld [vmem:[#allocation7 + $0x18] sm:$0xff]  ;;  %v158_v24 = vld [vmem:[#allocation7 + $0x8] sm:$0xff]  ;;  %v157_v25 = vld [vmem:[#allocation7] sm:$0xff] }
  0x1f   :  { %144 = vmatpush.msra.mxu0 %v116_v7  ;;  %v217_v26 = vld [vmem:[#allocation8 + $0x78] sm:$0xff]  ;;  %v216_v27 = vld [vmem:[#allocation8 + $0x70] sm:$0xff]  ;;  %v215_v28 = vld [vmem:[#allocation8 + $0x68] sm:$0xff] }
  0x20   :  { %181 = vmatpush.msra.mxu1 %v168_v10  ;;  %222 = vmatpush.msra.mxu2 %v217_v26  ;;  %v214_v29 = vld [vmem:[#allocation8 + $0x60] sm:$0xff]  ;;  %v213_v30 = vld [vmem:[#allocation8 + $0x58] sm:$0xff]  ;;  %v212_v31 = vld [vmem:[#allocation8 + $0x50] sm:$0xff] }
  0x21   :  { %145 = vmatpush.msra.mxu0 %v115_v9  ;;  %v211_v32 = vld [vmem:[#allocation8 + $0x48] sm:$0xff]  ;;  %v210_v33 = vld [vmem:[#allocation8 + $0x40] sm:$0xff]  ;;  %v209_v34 = vld [vmem:[#allocation8 + $0x38] sm:$0xff] }
  0x22   :  { %182 = vmatpush.msra.mxu1 %v167_v12  ;;  %223 = vmatpush.msra.mxu2 %v216_v27  ;;  %v367_v35 = vld [vmem:[%s639_s2] ss:$0 sm:$0xff]  ;;  %v207_v37 = vld [vmem:[#allocation8 + $0x28] sm:$0xff]  ;;  %v206_v40 = vld [vmem:[#allocation8 + $0x20] sm:$0xff] }
  0x23   :  { %146 = vmatpush.msra.mxu0 %v114_v11  ;;  %v208_v36 = vld [vmem:[#allocation8 + $0x30] sm:$0xff]  ;;  %v205_v42 = vld [vmem:[#allocation8 + $0x18] sm:$0xff]  ;;  %v203_v47 = vld [vmem:[#allocation8 + $0x8] sm:$0xff] }
  0x24   :  { %183 = vmatpush.msra.mxu1 %v166_v15  ;;  %224 = vmatpush.msra.mxu2 %v215_v28  ;;  %v204_v46 = vld [vmem:[#allocation8 + $0x10] sm:$0xff]  ;;  %v202_v48 = vld [vmem:[#allocation8] sm:$0xff]  ;;  %v262_v49 = vld [vmem:[#allocation10 + $0x78] sm:$0xff] }
  0x25   :  { %147 = vmatpush.msra.mxu0 %v113_v13  ;;  %v261_v50 = vld [vmem:[#allocation10 + $0x70] sm:$0xff]  ;;  %267 = vmatpush.msra.mxu3 %v262_v49  ;;  %v260_v51 = vld [vmem:[#allocation10 + $0x68] sm:$0xff]  ;;  %v259_v52 = vld [vmem:[#allocation10 + $0x60] sm:$0xff] }
  0x26   :  { %357 = vmatmul.msk.f32.vlgmr.msra.gmra.mxu0 %vm125_vm0, %v111_v14  ;;  %184 = vmatpush.msra.mxu1 %v165_v16  ;;  %v258_v53 = vld [vmem:[#allocation10 + $0x58] sm:$0xff]  ;;  %v257_v54 = vld [vmem:[#allocation10 + $0x50] sm:$0xff]  ;;  %v256_v55 = vld [vmem:[#allocation10 + $0x48] sm:$0xff] }
  0x27   :  { %225 = vmatpush.msra.mxu2 %v214_v29  ;;  %268 = vmatpush.msra.mxu3 %v261_v50  ;;  %v255_v56 = vld [vmem:[#allocation10 + $0x40] sm:$0xff]  ;;  %v254_v57 = vld [vmem:[#allocation10 + $0x38] sm:$0xff]  ;;  %v368_v58 = vld [vmem:[%s641_s4] ss:$0 sm:$0xff] }
  0x28   :  { %185 = vmatpush.msra.mxu1 %v164_v17  ;;  %v253_v59 = vld [vmem:[#allocation10 + $0x30] sm:$0xff]  ;;  %v252_v60 = vld [vmem:[#allocation10 + $0x28] sm:$0xff]  ;;  %v251_v63 = vld [vmem:[#allocation10 + $0x20] sm:$0xff] }
  0x29   :  { %226 = vmatpush.msra.mxu2 %v213_v30  ;;  %269 = vmatpush.msra.mxu3 %v260_v51  ;;  %v250_v1 = vld [vmem:[#allocation10 + $0x18] sm:$0xff]  ;;  %v249_v5 = vld [vmem:[#allocation10 + $0x10] sm:$0xff]  ;;  %v248_v6 = vld [vmem:[#allocation10 + $0x8] sm:$0xff] }
  0x2a   :  { %186 = vmatpush.msra.mxu1 %v163_v18  ;;  %v247_v7 = vld [vmem:[#allocation10] sm:$0xff]  ;;  %v369_v8 = vld [vmem:[%s643_s6] ss:$0 sm:$0xff]  ;;  %s538_s6 = smov [#allocation11]  }
  0x2b   :  { %227 = vmatpush.msra.mxu2 %v212_v31  ;;  %270 = vmatpush.msra.mxu3 %v259_v52  ;;  %v370_v15 = vld [vmem:[%s645_s8] ss:$0 sm:$0xff]  ;;  %s340_s8 = sshll.u32 %s538_s6, 4  ;;  %s341_s8 = int_to_ptr.vmem [resolvable:$true] %s340_s8 }
  0x2c   :  { %187 = vmatpush.msra.mxu1 %v162_v20 }
  0x2d   :  { %228 = vmatpush.msra.mxu2 %v211_v32  ;;  %271 = vmatpush.msra.mxu3 %v258_v53 }
  0x2e   :  { %358 = vmatmul.msk.f32.gmra.mxu0 %vm125_vm0, %v112_v19  ;;  %188 = vmatpush.msra.mxu1 %v161_v21 }
  0x2f   :  { %229 = vmatpush.msra.mxu2 %v210_v33  ;;  %272 = vmatpush.msra.mxu3 %v257_v54 }
  0x30   :  { %189 = vmatpush.msra.mxu1 %v160_v22 }
  0x31   :  { %230 = vmatpush.msra.mxu2 %v209_v34  ;;  %273 = vmatpush.msra.mxu3 %v256_v55 }
  0x32   :  { %190 = vmatpush.msra.mxu1 %v159_v23 }
  0x33   :  { %231 = vmatpush.msra.mxu2 %v208_v36  ;;  %274 = vmatpush.msra.mxu3 %v255_v56 }
  0x34   :  { %191 = vmatpush.msra.mxu1 %v158_v24 }
  0x35   :  { %232 = vmatpush.msra.mxu2 %v207_v37  ;;  %275 = vmatpush.msra.mxu3 %v254_v57 }
  0x36   :  { %192 = vmatpush.msra.mxu1 %v157_v25 }
  0x37   :  { %233 = vmatpush.msra.mxu2 %v206_v40  ;;  %276 = vmatpush.msra.mxu3 %v253_v59 }
  0x39   :  { %234 = vmatpush.msra.mxu2 %v205_v42  ;;  %277 = vmatpush.msra.mxu3 %v252_v60 }
  0x3b   :  { %235 = vmatpush.msra.mxu2 %v204_v46  ;;  %278 = vmatpush.msra.mxu3 %v251_v63 }
  0x3d   :  { %236 = vmatpush.msra.mxu2 %v203_v47  ;;  %279 = vmatpush.msra.mxu3 %v250_v1 }
  0x3f   :  { %237 = vmatpush.msra.mxu2 %v202_v48  ;;  %280 = vmatpush.msra.mxu3 %v249_v5 }
  0x41   :  { %281 = vmatpush.msra.mxu3 %v248_v6 }
  0x43   :  { %282 = vmatpush.msra.mxu3 %v247_v7 }
  0xa3   :  { %v149_v38 = vpop.f32.mrf.mxu0 }
  0xa4   :  { %v150_v39 = vadd.f32 %v367_v35, %v149_v38 }
  0xa6   :  { %v155_v41 = vmax.f32 %v150_v39, 0.0 }
  0xa8   :  { %193 = vmatmul.f32.vlgmr.msra.gmra.mxu1 %v155_v41 }
  0xab   :  { %v152_v43 = vpop.f32.mrf.mxu0 }
  0xac   :  { %v153_v44 = vadd.f32 %v367_v35, %v152_v43 }
  0xae   :  { %v156_v45 = vmax.f32 %v153_v44, 0.0 }
  0xb0   :  { %196 = vmatmul.f32.gmra.mxu1 %v156_v45 }
 0x125   :  { %v194_v61 = vpop.f32.mrf.mxu1 }
 0x126   :  { %v195_v62 = vadd.f32 %v368_v58, %v194_v61 }
 0x128   :  { %v200_v0 = vmax.f32 %v195_v62, 0.0 }
 0x12a   :  { %238 = vmatmul.f32.vlgmr.msra.gmra.mxu2 %v200_v0 }
 0x12d   :  { %v197_v2 = vpop.f32.mrf.mxu1 }
 0x12e   :  { %v198_v3 = vadd.f32 %v368_v58, %v197_v2 }
 0x130   :  { %v201_v4 = vmax.f32 %v198_v3, 0.0 }
 0x132   :  { %241 = vmatmul.f32.gmra.mxu2 %v201_v4 }
 0x1ad   :  { %v239_v9 = vpop.f32.mrf.mxu2 }
 0x1ae   :  { %v240_v10 = vadd.f32 %v369_v8, %v239_v9 }
 0x1b0   :  { %v245_v11 = vmax.f32 %v240_v10, 0.0 }
 0x1b2   :  { %283 = vmatmul.f32.vlgmr.msra.gmra.mxu3 %v245_v11 }
 0x1b5   :  { %v242_v12 = vpop.f32.mrf.mxu2 }
 0x1b6   :  { %v243_v13 = vadd.f32 %v369_v8, %v242_v12 }
 0x1b8   :  { %v246_v14 = vmax.f32 %v243_v13, 0.0 }
 0x1ba   :  { %286 = vmatmul.f32.gmra.mxu3 %v246_v14 }
 0x235   :  { %v284_v16 = vpop.f32.mrf.mxu3 }
 0x236   :  { %v285_v17 = vadd.f32 %v370_v15, %v284_v16 }
 0x238   :  { %290 = vmax.xlane.f32.xlu0 %v285_v17 }
 0x23d   :  { %v287_v18 = vpop.f32.mrf.mxu3 }
 0x23e   :  { %v288_v19 = vadd.f32 %v370_v15, %v287_v18 }
 0x240   :  { %292 = vmax.xlane.f32.xlu0 %v288_v19 }
 0x2ab   :  { %v291_v20 = vpop.xlane.xlu0 %290 }
 0x2ac   :  { %v294_v21 = vsub.f32 %v285_v17, %v291_v20 }
 0x2ae   :  { %v296_v22 = vmul.f32 1.442695, %v294_v21 }
 0x2b0   :  { %371 = vpow2.f32 %v296_v22 }
 0x2b3   :  { %v293_v23 = vpop.xlane.xlu0 %292 }
 0x2b4   :  { %v295_v24 = vsub.f32 %v288_v19, %v293_v23 }
 0x2b6   :  { %v372_v25 = vpop.eup %371  ;;  %v298_v26 = vmul.f32 1.442695, %v295_v24 }
 0x2b7   :  { %300 = vadd.xlane.f32.xlu1 %v372_v25 }
 0x2b8   :  { %373 = vpow2.f32 %v298_v26 }
 0x2be   :  { %v374_v27 = vpop.eup %373 }
 0x2bf   :  { %302 = vadd.xlane.f32.xlu1 %v374_v27 }
 0x32a   :  { %v301_v28 = vpop.xlane.xlu1 %300 }
 0x32b   :  { %375 = vrcp.f32 %v301_v28  ;;  %v315_v33 = vand.u32 2147483648, %v301_v28  ;;  %v313_v35 = vand.u32 2147483647, %v301_v28  ;;  %vm309_vm2 = vweird.f32 %v301_v28 }
 0x32d   :  { %v316_v38 = vor.u32 1.1754944e-38, %v315_v33  ;;  %vm314_vm4 = vcmp.eq.f32.partialorder %v313_v35, 8.507059e+37 }
 0x331   :  { %v376_v29 = vpop.eup %375 }
 0x332   :  { %v305_v30 = vmul.f32 %v376_v29, %v301_v28  ;;  %v303_v31 = vpop.xlane.xlu1 %302  ;;  %vm310_vm1 = vweird.f32 %v376_v29 }
 0x333   :  { %377 = vrcp.f32 %v303_v31  ;;  %vm311_vm3 = vmor %vm309_vm2, %vm310_vm1  ;;  %v330_v44 = vand.u32 2147483648, %v303_v31  ;;  %v328_v46 = vand.u32 2147483647, %v303_v31  ;;  %vm324_vm6 = vweird.f32 %v303_v31 }
 0x334   :  { %v306_v32 = vsub.f32 1.0, %v305_v30 }
 0x335   :  { %v331_v48 = vor.u32 1.1754944e-38, %v330_v44  ;;  %vm329_vm8 = vcmp.eq.f32.partialorder %v328_v46, 8.507059e+37 }
 0x336   :  { %v307_v34 = vmul.f32 %v376_v29, %v306_v32 }
 0x338   :  { %v308_v36 = vadd.f32 %v376_v29, %v307_v34 }
 0x339   :  { %v378_v37 = vpop.eup %377 }
 0x33a   :  { %v320_v39 = vmul.f32 %v378_v37, %v303_v31  ;;  %v312_v40 = vsel %vm311_vm3, %v376_v29, %v308_v36  ;;  %vm325_vm5 = vweird.f32 %v378_v37 }
 0x33b   :  { %v317_v41 = vsel %vm314_vm4, %v316_v38, %v312_v40  ;;  %vm326_vm7 = vmor %vm324_vm6, %vm325_vm5 }
 0x33c   :  { %v321_v42 = vsub.f32 1.0, %v320_v39  ;;  %v318_v43 = vmul.f32 %v372_v25, %v317_v41 }
 0x33e   :  { %v322_v45 = vmul.f32 %v378_v37, %v321_v42  ;;  %334 = vst [vmem:[#allocation11] sm:$0xff] %v318_v43 }
 0x340   :  { %v323_v47 = vadd.f32 %v378_v37, %v322_v45 }
 0x342   :  { %v327_v49 = vsel %vm326_vm7, %v378_v37, %v323_v47 }
 0x343   :  { %v332_v50 = vsel %vm329_vm8, %v331_v48, %v327_v49 }
 0x344   :  { %v333_v51 = vmul.f32 %v374_v27, %v332_v50 }
 0x346   :  { %335 = vst [vmem:[#allocation11 + $0x8] sm:$0xff] %v333_v51 }
 0x347   :  { %348 = dma.vmem_to_hbm [thread:$0]  %s341_s8, 256, %s343_s20, [#allocation4], %s532_s17, %s532_s17, %s533_s18  }
 0x348   :  { %529 = dma.done.wait [#allocation4], 256  }
 0x349   :  { %530 = vsyncadd [#allocation4], 4294967040 }
 0x34a   :  { %353 = vsyncpa [#allocation3], 1 }
 0x34b   :  { %354 = vsyncpa [#allocation6], 1 }
 0x34c   :  { %355 = vsyncpa [#allocation9], 1 }
 0x34d   :  { %356 = vsyncpa [#allocation4], 1 }

</bundles_post_ra>
